<compile_context>
chip_gen: v5e
topology: v5e:2x2
jax: 0.10.0
libtpu: 0.0.40
codegen_flags: <defaults>
</compile_context>

<pallas_src>
import functools

import jax
import jax.numpy as jnp
from jax.experimental import pallas as pl
from jax.experimental.pallas import tpu as pltpu


def _lstm_kernel(x_ref, w_ih_ref, w_hh_ref, b_ref, w_lin_ref, b_lin_ref, out_ref,
                 *, seq_len, batch_pad, hidden):
    S, Bp, H = seq_len, batch_pad, hidden

    # --- Pre-pass (no serial dependence): input projection + bias for ALL timesteps,
    # one (S*Bp, E) x (E, 4H) matmul.  Kept as a value (vregs), not VMEM scratch.
    gx = (jnp.dot(x_ref[...], w_ih_ref[...], preferred_element_type=jnp.float32)
          + b_ref[...])                               # (S*Bp, 4H), row = t*Bp + b

    # Loop-invariant recurrent weight, loaded once.
    w_hh = w_hh_ref[...]                              # (H, 4H)

    h = jnp.zeros((Bp, H), jnp.float32)
    c = jnp.zeros((Bp, H), jnp.float32)

    # S is small and static -> fully unroll with static, 8-sublane-aligned slices.
    for t in range(S):
        # Only the recurrent matmul remains on the serial critical path.
        gates = gx[t * Bp:(t + 1) * Bp, :] + jnp.dot(
            h, w_hh, preferred_element_type=jnp.float32)        # (Bp, 4H)

        # Full-width transcendentals (EUP), then static lane slices.
        # PyTorch gate order: i, f, g, o.
        sig = jax.nn.sigmoid(gates)
        th = jnp.tanh(gates)
        i_g = sig[:, 0 * H:1 * H]
        f_g = sig[:, 1 * H:2 * H]
        g_g = th[:, 2 * H:3 * H]
        o_g = sig[:, 3 * H:4 * H]

        c = f_g * c + i_g * g_g
        h = o_g * jnp.tanh(c)

    # Fused Linear head on the last hidden state (padded rows are garbage, sliced off outside).
    out_ref[...] = (jnp.dot(h, w_lin_ref[...], preferred_element_type=jnp.float32)
                    + b_lin_ref[...])


def lstm_forecast(x, w_ih_T, w_hh_T, b_gates, w_lin_T, b_lin, pred_len, c_out):
    B, S, E = x.shape
    H = w_hh_T.shape[0]
    O = w_lin_T.shape[1]                              # pred_len * c_out

    # Pad batch up to the native 8-sublane tile so every in-kernel tile is aligned.
    Bp = max(8, -(-B // 8) * 8)

    # Time-major, batch-padded, flattened to (S*Bp, E): row = t*Bp + b.  Pure layout
    # plumbing done outside the kernel so no in-kernel reshapes/transposes are needed.
    x_pad = jnp.zeros((Bp, S, E), x.dtype).at[:B].set(x)
    x_tm = jnp.transpose(x_pad, (1, 0, 2)).reshape(S * Bp, E)

    kernel = functools.partial(_lstm_kernel, seq_len=S, batch_pad=Bp, hidden=H)

    # Advisory cost hint so XLA schedules surrounding ops around this latency-bound call.
    flops = (2 * S * Bp * E * 4 * H          # hoisted input projection
             + 2 * S * Bp * H * 4 * H        # recurrent matmuls
             + 2 * Bp * H * O)               # linear head
    transcendentals = S * Bp * (2 * 4 * H + H)   # full-width sigmoid+tanh + tanh(c)
    bytes_accessed = 4 * (x_tm.size + w_ih_T.size + w_hh_T.size + b_gates.size
                          + w_lin_T.size + b_lin.size + Bp * O)

    out = pl.pallas_call(
        kernel,
        out_shape=jax.ShapeDtypeStruct((Bp, O), jnp.float32),
        in_specs=[pl.BlockSpec(memory_space=pltpu.MemorySpace.VMEM)
                  for _ in range(6)],
        out_specs=pl.BlockSpec(memory_space=pltpu.MemorySpace.VMEM),
        cost_estimate=pl.CostEstimate(flops=flops,
                                      transcendentals=transcendentals,
                                      bytes_accessed=bytes_accessed),
    )(x_tm, w_ih_T, w_hh_T, b_gates, w_lin_T, b_lin)

    return out[:B].reshape(-1, pred_len, c_out)


def init_params(key, enc_in, d_model, pred_len, c_out):
    ks = jax.random.split(key, 6)
    scale = 1.0 / jnp.sqrt(d_model)
    w_ih = jax.random.uniform(ks[0], (4 * d_model, enc_in), jnp.float32, -scale, scale)
    w_hh = jax.random.uniform(ks[1], (4 * d_model, d_model), jnp.float32, -scale, scale)
    b_ih = jax.random.uniform(ks[2], (4 * d_model,), jnp.float32, -scale, scale)
    b_hh = jax.random.uniform(ks[3], (4 * d_model,), jnp.float32, -scale, scale)
    w_lin = jax.random.uniform(ks[4], (pred_len * c_out, d_model), jnp.float32, -scale, scale)
    b_lin = jax.random.uniform(ks[5], (pred_len * c_out,), jnp.float32, -scale, scale)
    return {
        "w_ih_T": w_ih.T,                      # (E, 4H)
        "w_hh_T": w_hh.T,                      # (H, 4H)
        "b_gates": (b_ih + b_hh)[None, :],     # (1, 4H)
        "w_lin_T": w_lin.T,                    # (H, P*C)
        "b_lin": b_lin[None, :],               # (1, P*C)
    }


def reference_forward(x, params, pred_len, c_out):
    """Pure-JAX reference of the PyTorch module for the correctness check."""
    B, S, E = x.shape
    H = params["w_hh_T"].shape[0]
    h = jnp.zeros((B, H), jnp.float32)
    c = jnp.zeros((B, H), jnp.float32)
    for t in range(S):
        gates = x[:, t, :] @ params["w_ih_T"] + h @ params["w_hh_T"] + params["b_gates"]
        i = jax.nn.sigmoid(gates[:, 0 * H:1 * H])
        f = jax.nn.sigmoid(gates[:, 1 * H:2 * H])
        g = jnp.tanh(gates[:, 2 * H:3 * H])
        o = jax.nn.sigmoid(gates[:, 3 * H:4 * H])
        c = f * c + i * g
        h = o * jnp.tanh(c)
    out = h @ params["w_lin_T"] + params["b_lin"]
    return out.reshape(-1, pred_len, c_out)


if __name__ == "__main__":
    # Small config consistent with the module: enc_in=4, d_model=32, pred_len=4, c_out=4.
    B, S, enc_in, d_model, pred_len, c_out = 2, 8, 4, 32, 4, 4

    key = jax.random.PRNGKey(0)
    kx, kp = jax.random.split(key)
    x = jax.random.normal(kx, (B, S, enc_in), jnp.float32)
    params = init_params(kp, enc_in, d_model, pred_len, c_out)

    out = lstm_forecast(x, params["w_ih_T"], params["w_hh_T"], params["b_gates"],
                        params["w_lin_T"], params["b_lin"], pred_len, c_out)
    out = jax.block_until_ready(out)

    ref = reference_forward(x, params, pred_len, c_out)
    assert out.shape == (B, pred_len, c_out), out.shape
    assert jnp.allclose(out, ref, atol=1e-5, rtol=1e-5), float(jnp.max(jnp.abs(out - ref)))
    print("KERNEL_OK")
</pallas_src>

<mosaic_0001>
module attributes {stable_mosaic.version = 11 : i64} {
  func.func @_lstm_kernel(%arg0: memref<64x4xf32, #tpu.memory_space<vmem>>, %arg1: memref<4x128xf32, #tpu.memory_space<vmem>>, %arg2: memref<32x128xf32, #tpu.memory_space<vmem>>, %arg3: memref<1x128xf32, #tpu.memory_space<vmem>>, %arg4: memref<32x16xf32, #tpu.memory_space<vmem>>, %arg5: memref<1x16xf32, #tpu.memory_space<vmem>>, %arg6: memref<8x16xf32, #tpu.memory_space<vmem>>) attributes {dimension_semantics = [], scalar_prefetch = 0 : i64, scratch_operands = 0 : i64, tpu.core_type = #tpu.core_type<tc>} {
    %c0 = arith.constant 0 : index
    %c0_0 = arith.constant 0 : index
    %0 = vector.load %arg0[%c0, %c0_0] : memref<64x4xf32, #tpu.memory_space<vmem>>, vector<64x4xf32>
    %c0_1 = arith.constant 0 : index
    %c0_2 = arith.constant 0 : index
    %1 = vector.load %arg1[%c0_1, %c0_2] : memref<4x128xf32, #tpu.memory_space<vmem>>, vector<4x128xf32>
    %cst = arith.constant dense<0.000000e+00> : vector<64x128xf32>
    %2 = tpu.matmul %0, %1, %cst {dimension_numbers = #tpu.dot_dimension_numbers<[1], [0], [0], [1], [0, 0, 1, 1], [], []>} : vector<64x4xf32>, vector<4x128xf32>, vector<64x128xf32> -> vector<64x128xf32>
    %c0_3 = arith.constant 0 : index
    %c0_4 = arith.constant 0 : index
    %3 = vector.load %arg3[%c0_3, %c0_4] : memref<1x128xf32, #tpu.memory_space<vmem>>, vector<1x128xf32>
    %4 = vector.broadcast %3 : vector<1x128xf32> to vector<64x128xf32>
    %5 = arith.addf %2, %4 : vector<64x128xf32>
    %c0_5 = arith.constant 0 : index
    %c0_6 = arith.constant 0 : index
    %6 = vector.load %arg2[%c0_5, %c0_6] : memref<32x128xf32, #tpu.memory_space<vmem>>, vector<32x128xf32>
    %cst_7 = arith.constant 0.000000e+00 : f32
    %7 = vector.broadcast %cst_7 : f32 to vector<8x32xf32>
    %cst_8 = arith.constant 0.000000e+00 : f32
    %8 = vector.broadcast %cst_8 : f32 to vector<8x32xf32>
    %9 = vector.extract_strided_slice %5 {offsets = [0, 0], sizes = [8, 128], strides = [1, 1]} : vector<64x128xf32> to vector<8x128xf32>
    %cst_9 = arith.constant dense<0.000000e+00> : vector<8x128xf32>
    %10 = tpu.matmul %7, %6, %cst_9 {dimension_numbers = #tpu.dot_dimension_numbers<[1], [0], [0], [1], [0, 0, 1, 1], [], []>} : vector<8x32xf32>, vector<32x128xf32>, vector<8x128xf32> -> vector<8x128xf32>
    %11 = arith.addf %9, %10 : vector<8x128xf32>
    %12 = arith.negf %11 : vector<8x128xf32>
    %13 = math.exp %12 : vector<8x128xf32>
    %cst_10 = arith.constant 1.000000e+00 : f32
    %14 = vector.broadcast %cst_10 : f32 to vector<8x128xf32>
    %15 = arith.addf %14, %13 : vector<8x128xf32>
    %16 = arith.divf %14, %15 : vector<8x128xf32>
    %17 = math.tanh %11 : vector<8x128xf32>
    %18 = vector.extract_strided_slice %16 {offsets = [0, 0], sizes = [8, 32], strides = [1, 1]} : vector<8x128xf32> to vector<8x32xf32>
    %19 = vector.extract_strided_slice %16 {offsets = [0, 32], sizes = [8, 32], strides = [1, 1]} : vector<8x128xf32> to vector<8x32xf32>
    %20 = vector.extract_strided_slice %17 {offsets = [0, 64], sizes = [8, 32], strides = [1, 1]} : vector<8x128xf32> to vector<8x32xf32>
    %21 = vector.extract_strided_slice %16 {offsets = [0, 96], sizes = [8, 32], strides = [1, 1]} : vector<8x128xf32> to vector<8x32xf32>
    %22 = arith.mulf %19, %8 : vector<8x32xf32>
    %23 = arith.mulf %18, %20 : vector<8x32xf32>
    %24 = arith.addf %22, %23 : vector<8x32xf32>
    %25 = math.tanh %24 : vector<8x32xf32>
    %26 = arith.mulf %21, %25 : vector<8x32xf32>
    %27 = vector.extract_strided_slice %5 {offsets = [8, 0], sizes = [8, 128], strides = [1, 1]} : vector<64x128xf32> to vector<8x128xf32>
    %cst_11 = arith.constant dense<0.000000e+00> : vector<8x128xf32>
    %28 = tpu.matmul %26, %6, %cst_11 {dimension_numbers = #tpu.dot_dimension_numbers<[1], [0], [0], [1], [0, 0, 1, 1], [], []>} : vector<8x32xf32>, vector<32x128xf32>, vector<8x128xf32> -> vector<8x128xf32>
    %29 = arith.addf %27, %28 : vector<8x128xf32>
    %30 = arith.negf %29 : vector<8x128xf32>
    %31 = math.exp %30 : vector<8x128xf32>
    %cst_12 = arith.constant 1.000000e+00 : f32
    %32 = vector.broadcast %cst_12 : f32 to vector<8x128xf32>
    %33 = arith.addf %32, %31 : vector<8x128xf32>
    %34 = arith.divf %32, %33 : vector<8x128xf32>
    %35 = math.tanh %29 : vector<8x128xf32>
    %36 = vector.extract_strided_slice %34 {offsets = [0, 0], sizes = [8, 32], strides = [1, 1]} : vector<8x128xf32> to vector<8x32xf32>
    %37 = vector.extract_strided_slice %34 {offsets = [0, 32], sizes = [8, 32], strides = [1, 1]} : vector<8x128xf32> to vector<8x32xf32>
    %38 = vector.extract_strided_slice %35 {offsets = [0, 64], sizes = [8, 32], strides = [1, 1]} : vector<8x128xf32> to vector<8x32xf32>
    %39 = vector.extract_strided_slice %34 {offsets = [0, 96], sizes = [8, 32], strides = [1, 1]} : vector<8x128xf32> to vector<8x32xf32>
    %40 = arith.mulf %37, %24 : vector<8x32xf32>
    %41 = arith.mulf %36, %38 : vector<8x32xf32>
    %42 = arith.addf %40, %41 : vector<8x32xf32>
    %43 = math.tanh %42 : vector<8x32xf32>
    %44 = arith.mulf %39, %43 : vector<8x32xf32>
    %45 = vector.extract_strided_slice %5 {offsets = [16, 0], sizes = [8, 128], strides = [1, 1]} : vector<64x128xf32> to vector<8x128xf32>
    %cst_13 = arith.constant dense<0.000000e+00> : vector<8x128xf32>
    %46 = tpu.matmul %44, %6, %cst_13 {dimension_numbers = #tpu.dot_dimension_numbers<[1], [0], [0], [1], [0, 0, 1, 1], [], []>} : vector<8x32xf32>, vector<32x128xf32>, vector<8x128xf32> -> vector<8x128xf32>
    %47 = arith.addf %45, %46 : vector<8x128xf32>
    %48 = arith.negf %47 : vector<8x128xf32>
    %49 = math.exp %48 : vector<8x128xf32>
    %cst_14 = arith.constant 1.000000e+00 : f32
    %50 = vector.broadcast %cst_14 : f32 to vector<8x128xf32>
    %51 = arith.addf %50, %49 : vector<8x128xf32>
    %52 = arith.divf %50, %51 : vector<8x128xf32>
    %53 = math.tanh %47 : vector<8x128xf32>
    %54 = vector.extract_strided_slice %52 {offsets = [0, 0], sizes = [8, 32], strides = [1, 1]} : vector<8x128xf32> to vector<8x32xf32>
    %55 = vector.extract_strided_slice %52 {offsets = [0, 32], sizes = [8, 32], strides = [1, 1]} : vector<8x128xf32> to vector<8x32xf32>
    %56 = vector.extract_strided_slice %53 {offsets = [0, 64], sizes = [8, 32], strides = [1, 1]} : vector<8x128xf32> to vector<8x32xf32>
    %57 = vector.extract_strided_slice %52 {offsets = [0, 96], sizes = [8, 32], strides = [1, 1]} : vector<8x128xf32> to vector<8x32xf32>
    %58 = arith.mulf %55, %42 : vector<8x32xf32>
    %59 = arith.mulf %54, %56 : vector<8x32xf32>
    %60 = arith.addf %58, %59 : vector<8x32xf32>
    %61 = math.tanh %60 : vector<8x32xf32>
    %62 = arith.mulf %57, %61 : vector<8x32xf32>
    %63 = vector.extract_strided_slice %5 {offsets = [24, 0], sizes = [8, 128], strides = [1, 1]} : vector<64x128xf32> to vector<8x128xf32>
    %cst_15 = arith.constant dense<0.000000e+00> : vector<8x128xf32>
    %64 = tpu.matmul %62, %6, %cst_15 {dimension_numbers = #tpu.dot_dimension_numbers<[1], [0], [0], [1], [0, 0, 1, 1], [], []>} : vector<8x32xf32>, vector<32x128xf32>, vector<8x128xf32> -> vector<8x128xf32>
    %65 = arith.addf %63, %64 : vector<8x128xf32>
    %66 = arith.negf %65 : vector<8x128xf32>
    %67 = math.exp %66 : vector<8x128xf32>
    %cst_16 = arith.constant 1.000000e+00 : f32
    %68 = vector.broadcast %cst_16 : f32 to vector<8x128xf32>
    %69 = arith.addf %68, %67 : vector<8x128xf32>
    %70 = arith.divf %68, %69 : vector<8x128xf32>
    %71 = math.tanh %65 : vector<8x128xf32>
    %72 = vector.extract_strided_slice %70 {offsets = [0, 0], sizes = [8, 32], strides = [1, 1]} : vector<8x128xf32> to vector<8x32xf32>
    %73 = vector.extract_strided_slice %70 {offsets = [0, 32], sizes = [8, 32], strides = [1, 1]} : vector<8x128xf32> to vector<8x32xf32>
    %74 = vector.extract_strided_slice %71 {offsets = [0, 64], sizes = [8, 32], strides = [1, 1]} : vector<8x128xf32> to vector<8x32xf32>
    %75 = vector.extract_strided_slice %70 {offsets = [0, 96], sizes = [8, 32], strides = [1, 1]} : vector<8x128xf32> to vector<8x32xf32>
    %76 = arith.mulf %73, %60 : vector<8x32xf32>
    %77 = arith.mulf %72, %74 : vector<8x32xf32>
    %78 = arith.addf %76, %77 : vector<8x32xf32>
    %79 = math.tanh %78 : vector<8x32xf32>
    %80 = arith.mulf %75, %79 : vector<8x32xf32>
    %81 = vector.extract_strided_slice %5 {offsets = [32, 0], sizes = [8, 128], strides = [1, 1]} : vector<64x128xf32> to vector<8x128xf32>
    %cst_17 = arith.constant dense<0.000000e+00> : vector<8x128xf32>
    %82 = tpu.matmul %80, %6, %cst_17 {dimension_numbers = #tpu.dot_dimension_numbers<[1], [0], [0], [1], [0, 0, 1, 1], [], []>} : vector<8x32xf32>, vector<32x128xf32>, vector<8x128xf32> -> vector<8x128xf32>
    %83 = arith.addf %81, %82 : vector<8x128xf32>
    %84 = arith.negf %83 : vector<8x128xf32>
    %85 = math.exp %84 : vector<8x128xf32>
    %cst_18 = arith.constant 1.000000e+00 : f32
    %86 = vector.broadcast %cst_18 : f32 to vector<8x128xf32>
    %87 = arith.addf %86, %85 : vector<8x128xf32>
    %88 = arith.divf %86, %87 : vector<8x128xf32>
    %89 = math.tanh %83 : vector<8x128xf32>
    %90 = vector.extract_strided_slice %88 {offsets = [0, 0], sizes = [8, 32], strides = [1, 1]} : vector<8x128xf32> to vector<8x32xf32>
    %91 = vector.extract_strided_slice %88 {offsets = [0, 32], sizes = [8, 32], strides = [1, 1]} : vector<8x128xf32> to vector<8x32xf32>
    %92 = vector.extract_strided_slice %89 {offsets = [0, 64], sizes = [8, 32], strides = [1, 1]} : vector<8x128xf32> to vector<8x32xf32>
    %93 = vector.extract_strided_slice %88 {offsets = [0, 96], sizes = [8, 32], strides = [1, 1]} : vector<8x128xf32> to vector<8x32xf32>
    %94 = arith.mulf %91, %78 : vector<8x32xf32>
    %95 = arith.mulf %90, %92 : vector<8x32xf32>
    %96 = arith.addf %94, %95 : vector<8x32xf32>
    %97 = math.tanh %96 : vector<8x32xf32>
    %98 = arith.mulf %93, %97 : vector<8x32xf32>
    %99 = vector.extract_strided_slice %5 {offsets = [40, 0], sizes = [8, 128], strides = [1, 1]} : vector<64x128xf32> to vector<8x128xf32>
    %cst_19 = arith.constant dense<0.000000e+00> : vector<8x128xf32>
    %100 = tpu.matmul %98, %6, %cst_19 {dimension_numbers = #tpu.dot_dimension_numbers<[1], [0], [0], [1], [0, 0, 1, 1], [], []>} : vector<8x32xf32>, vector<32x128xf32>, vector<8x128xf32> -> vector<8x128xf32>
    %101 = arith.addf %99, %100 : vector<8x128xf32>
    %102 = arith.negf %101 : vector<8x128xf32>
    %103 = math.exp %102 : vector<8x128xf32>
    %cst_20 = arith.constant 1.000000e+00 : f32
    %104 = vector.broadcast %cst_20 : f32 to vector<8x128xf32>
    %105 = arith.addf %104, %103 : vector<8x128xf32>
    %106 = arith.divf %104, %105 : vector<8x128xf32>
    %107 = math.tanh %101 : vector<8x128xf32>
    %108 = vector.extract_strided_slice %106 {offsets = [0, 0], sizes = [8, 32], strides = [1, 1]} : vector<8x128xf32> to vector<8x32xf32>
    %109 = vector.extract_strided_slice %106 {offsets = [0, 32], sizes = [8, 32], strides = [1, 1]} : vector<8x128xf32> to vector<8x32xf32>
    %110 = vector.extract_strided_slice %107 {offsets = [0, 64], sizes = [8, 32], strides = [1, 1]} : vector<8x128xf32> to vector<8x32xf32>
    %111 = vector.extract_strided_slice %106 {offsets = [0, 96], sizes = [8, 32], strides = [1, 1]} : vector<8x128xf32> to vector<8x32xf32>
    %112 = arith.mulf %109, %96 : vector<8x32xf32>
    %113 = arith.mulf %108, %110 : vector<8x32xf32>
    %114 = arith.addf %112, %113 : vector<8x32xf32>
    %115 = math.tanh %114 : vector<8x32xf32>
    %116 = arith.mulf %111, %115 : vector<8x32xf32>
    %117 = vector.extract_strided_slice %5 {offsets = [48, 0], sizes = [8, 128], strides = [1, 1]} : vector<64x128xf32> to vector<8x128xf32>
    %cst_21 = arith.constant dense<0.000000e+00> : vector<8x128xf32>
    %118 = tpu.matmul %116, %6, %cst_21 {dimension_numbers = #tpu.dot_dimension_numbers<[1], [0], [0], [1], [0, 0, 1, 1], [], []>} : vector<8x32xf32>, vector<32x128xf32>, vector<8x128xf32> -> vector<8x128xf32>
    %119 = arith.addf %117, %118 : vector<8x128xf32>
    %120 = arith.negf %119 : vector<8x128xf32>
    %121 = math.exp %120 : vector<8x128xf32>
    %cst_22 = arith.constant 1.000000e+00 : f32
    %122 = vector.broadcast %cst_22 : f32 to vector<8x128xf32>
    %123 = arith.addf %122, %121 : vector<8x128xf32>
    %124 = arith.divf %122, %123 : vector<8x128xf32>
    %125 = math.tanh %119 : vector<8x128xf32>
    %126 = vector.extract_strided_slice %124 {offsets = [0, 0], sizes = [8, 32], strides = [1, 1]} : vector<8x128xf32> to vector<8x32xf32>
    %127 = vector.extract_strided_slice %124 {offsets = [0, 32], sizes = [8, 32], strides = [1, 1]} : vector<8x128xf32> to vector<8x32xf32>
    %128 = vector.extract_strided_slice %125 {offsets = [0, 64], sizes = [8, 32], strides = [1, 1]} : vector<8x128xf32> to vector<8x32xf32>
    %129 = vector.extract_strided_slice %124 {offsets = [0, 96], sizes = [8, 32], strides = [1, 1]} : vector<8x128xf32> to vector<8x32xf32>
    %130 = arith.mulf %127, %114 : vector<8x32xf32>
    %131 = arith.mulf %126, %128 : vector<8x32xf32>
    %132 = arith.addf %130, %131 : vector<8x32xf32>
    %133 = math.tanh %132 : vector<8x32xf32>
    %134 = arith.mulf %129, %133 : vector<8x32xf32>
    %135 = vector.extract_strided_slice %5 {offsets = [56, 0], sizes = [8, 128], strides = [1, 1]} : vector<64x128xf32> to vector<8x128xf32>
    %cst_23 = arith.constant dense<0.000000e+00> : vector<8x128xf32>
    %136 = tpu.matmul %134, %6, %cst_23 {dimension_numbers = #tpu.dot_dimension_numbers<[1], [0], [0], [1], [0, 0, 1, 1], [], []>} : vector<8x32xf32>, vector<32x128xf32>, vector<8x128xf32> -> vector<8x128xf32>
    %137 = arith.addf %135, %136 : vector<8x128xf32>
    %138 = arith.negf %137 : vector<8x128xf32>
    %139 = math.exp %138 : vector<8x128xf32>
    %cst_24 = arith.constant 1.000000e+00 : f32
    %140 = vector.broadcast %cst_24 : f32 to vector<8x128xf32>
    %141 = arith.addf %140, %139 : vector<8x128xf32>
    %142 = arith.divf %140, %141 : vector<8x128xf32>
    %143 = math.tanh %137 : vector<8x128xf32>
    %144 = vector.extract_strided_slice %142 {offsets = [0, 0], sizes = [8, 32], strides = [1, 1]} : vector<8x128xf32> to vector<8x32xf32>
    %145 = vector.extract_strided_slice %142 {offsets = [0, 32], sizes = [8, 32], strides = [1, 1]} : vector<8x128xf32> to vector<8x32xf32>
    %146 = vector.extract_strided_slice %143 {offsets = [0, 64], sizes = [8, 32], strides = [1, 1]} : vector<8x128xf32> to vector<8x32xf32>
    %147 = vector.extract_strided_slice %142 {offsets = [0, 96], sizes = [8, 32], strides = [1, 1]} : vector<8x128xf32> to vector<8x32xf32>
    %148 = arith.mulf %145, %132 : vector<8x32xf32>
    %149 = arith.mulf %144, %146 : vector<8x32xf32>
    %150 = arith.addf %148, %149 : vector<8x32xf32>
    %151 = math.tanh %150 : vector<8x32xf32>
    %152 = arith.mulf %147, %151 : vector<8x32xf32>
    %c0_25 = arith.constant 0 : index
    %c0_26 = arith.constant 0 : index
    %153 = vector.load %arg4[%c0_25, %c0_26] : memref<32x16xf32, #tpu.memory_space<vmem>>, vector<32x16xf32>
    %cst_27 = arith.constant dense<0.000000e+00> : vector<8x16xf32>
    %154 = tpu.matmul %152, %153, %cst_27 {dimension_numbers = #tpu.dot_dimension_numbers<[1], [0], [0], [1], [0, 0, 1, 1], [], []>} : vector<8x32xf32>, vector<32x16xf32>, vector<8x16xf32> -> vector<8x16xf32>
    %c0_28 = arith.constant 0 : index
    %c0_29 = arith.constant 0 : index
    %155 = vector.load %arg5[%c0_28, %c0_29] : memref<1x16xf32, #tpu.memory_space<vmem>>, vector<1x16xf32>
    %156 = vector.broadcast %155 : vector<1x16xf32> to vector<8x16xf32>
    %157 = arith.addf %154, %156 : vector<8x16xf32>
    %c0_30 = arith.constant 0 : index
    %c0_31 = arith.constant 0 : index
    %158 = vector.load %arg6[%c0_30, %c0_31] : memref<8x16xf32, #tpu.memory_space<vmem>>, vector<8x16xf32>
    tpu.vector_store %arg6[%c0_30, %c0_31], %157 {strides = array<i32>} : memref<8x16xf32, #tpu.memory_space<vmem>>, vector<8x16xf32>,
    return
  }
}

</mosaic_0001>

<bundles_post_ra>
// kernel: tpu_custom_call.1
= control target key start
LH: loop header
LB: loop body
LE: loop exit
PB: predicated region body
PF: predicated region fallthrough
CT: control target
= control target key end

     0   :  { %vm62_vm0 = vcmask 1043456   ;;  %vm37_vm1 = vcmask 31744   ;;  %s994_s0 = inlined_call_operand.vmem [shape: f32[64,4], index: 0, kind: input, shape index: {}]   ;;  %s995_s1 = inlined_call_operand.vmem [shape: f32[4,128], index: 1, kind: input, shape index: {}]   ;;  %s996_s2 = inlined_call_operand.vmem [shape: f32[32,128], index: 2, kind: input, shape index: {}]   ;;  %s997_s3 = inlined_call_operand.vmem [shape: f32[1,128], index: 3, kind: input, shape index: {}]   ;;  %s998_s4 = inlined_call_operand.vmem [shape: f32[32,16], index: 4, kind: input, shape index: {}]   ;;  %s999_s5 = inlined_call_operand.vmem [shape: f32[1,16], index: 5, kind: input, shape index: {}]   ;;  %s1000_s6 = inlined_call_operand.hbm [shape: f32[8,16], index: 6, kind: output, shape index: {}]  }
   0x1   :  { %v32_v0 = vld [vmem:[%s995_s1] sm:$0xf]  ;;  %v29_v1 = vld [vmem:[%s994_s0 + $0x28] sm:$0xff]  ;;  %v836_v2 = vld [vmem:[%s996_s2 + $0x18] sm:$0xff] }
   0x2   :  { %690 = vmatpush.msk.msra.mxu1 %vm62_vm0, %v32_v0  ;;  %665 = vmatpush.msk.msra.mxu0 %vm62_vm0, %v32_v0  ;;  %v24_v3 = vld [vmem:[%s994_s0] sm:$0xff]  ;;  %v845_v4 = vld [vmem:[%s996_s2 + $0x10] sm:$0xff] }
   0x3   :  { %671 = vmatmul.msk.f32.vlgmr.msra.gmra.mxu1 %vm37_vm1, %v29_v1  ;;  %666 = vmatmul.msk.f32.vlgmr.msra.gmra.mxu0 %vm37_vm1, %v24_v3 }
   0x4   :  { %127 = vmatpush.msrb.mxu1 %v836_v2  ;;  %691 = vmatpush.msk.msra.mxu2 %vm62_vm0, %v32_v0 }
   0x5   :  { %11 = vsyncpa [#allocation3], 0  ;;  %v852_v5 = vld [vmem:[%s996_s2 + $0x8] sm:$0xff]  ;;  %253 = vmatpush.msra.mxu3 %v836_v2  ;;  %v860_v6 = vld [vmem:[%s996_s2] sm:$0xff]  ;;  %v788_v7 = vmov 0.0   ;;  %s789_s11 = smov 64  }
   0x6   :  { %190 = vmatpush.msrb.mxu2 %v836_v2  ;;  %128 = vmatpush.msrb.mxu1 %v845_v4  ;;  %v887_v10 = vld [vmem:[%s997_s3] ss:$0 sm:$0xff]  ;;  %s790_s3 = smov 32   ;;  %v30_v34 = vld [vmem:[%s994_s0 + $0x30] sm:$0xff]  ;;  %v31_v35 = vld [vmem:[%s994_s0 + $0x38] sm:$0xff]  ;;  %vm111_vm6 = vcmask 261120  }
   0x7   :  { %254 = vmatpush.msra.mxu3 %v845_v4  ;;  %672 = vmatmul.msk.f32.vlgmr.msra.gmra.mxu2 %vm37_vm1, %v30_v34  ;;  %v25_v38 = vld [vmem:[%s994_s0 + $0x8] sm:$0xff]  ;;  %s791_s8 = smov [#allocation2]  }
   0x8   :  { %191 = vmatpush.msrb.mxu2 %v845_v4  ;;  %129 = vmatpush.msrb.mxu1 %v852_v5  ;;  %s654_s9 = sshll.u32 %s791_s8, 4  ;;  %s655_s9 = int_to_ptr.vmem [resolvable:$true] %s654_s9 }
   0x9   :  { %255 = vmatpush.msra.mxu3 %v852_v5 }
   0xa   :  { %192 = vmatpush.msrb.mxu2 %v852_v5  ;;  %130 = vmatpush.msrb.mxu1 %v860_v6 }
   0xb   :  { %131 = vmatmul.f32.vlgmr.msrb.gmra.mxu1 %v788_v7  ;;  %256 = vmatpush.msra.mxu3 %v860_v6 }
   0xc   :  { %193 = vmatpush.msrb.mxu2 %v860_v6  ;;  %316 = vmatpush.msra.mxu1 %v836_v2 }
   0xd   :  { %442 = vmatpush.msrb.mxu3 %v836_v2  ;;  %667 = vmatmul.msk.f32.gmra.mxu0 %vm37_vm1, %v25_v38 }
   0xe   :  { %317 = vmatpush.msra.mxu1 %v845_v4  ;;  %379 = vmatpush.msra.mxu2 %v836_v2 }
   0xf   :  { %443 = vmatpush.msrb.mxu3 %v845_v4  ;;  %673 = vmatmul.msk.f32.gmra.mxu2 %vm37_vm1, %v31_v35 }
  0x10   :  { %318 = vmatpush.msra.mxu1 %v852_v5  ;;  %380 = vmatpush.msra.mxu2 %v845_v4 }
  0x11   :  { %444 = vmatpush.msrb.mxu3 %v852_v5 }
  0x12   :  { %319 = vmatpush.msra.mxu1 %v860_v6  ;;  %381 = vmatpush.msra.mxu2 %v852_v5 }
  0x13   :  { %445 = vmatpush.msrb.mxu3 %v860_v6 }
  0x14   :  { %505 = vmatpush.msrb.mxu1 %v836_v2  ;;  %382 = vmatpush.msra.mxu2 %v860_v6 }
  0x16   :  { %506 = vmatpush.msrb.mxu1 %v845_v4 }
  0x18   :  { %507 = vmatpush.msrb.mxu1 %v852_v5 }
  0x1a   :  { %508 = vmatpush.msrb.mxu1 %v860_v6 }
  0x80   :  { %v882_v8 = vpop.f32.mrf.mxu1  ;;  %v83_v9 = vpop.f32.mrf.mxu0 }
  0x81   :  { %v84_v11 = vadd.f32 %v887_v10, %v83_v9 }
  0x88   :  { %v132_v12 = vpop.f32.mrf.mxu1 }
  0x89   :  { %v135_v13 = vadd.f32 %v132_v12, %v84_v11 }
  0x8a   :  { %v915_v40 = vpop.f32.mrf.mxu2  ;;  %v86_v42 = vpop.f32.mrf.mxu0 }
  0x8b   :  { %698 = vtanh.f32 %v135_v13  ;;  %v674_v15 = vmul.f32 -1.442695, %v135_v13  ;;  %v87_v43 = vadd.f32 %v887_v10, %v86_v42 }
  0x8d   :  { %700 = vpow2.f32 %v674_v15 }
  0x91   :  { %v699_v14 = vpop.eup %698 }
  0x92   :  { %158 = vrot.lane.b32.xlu0 %v699_v14, %s789_s11  ;;  %v917_v41 = vpop.f32.mrf.mxu2 }
  0x93   :  { %v701_v16 = vpop.eup %700 }
  0x94   :  { %v139_v17 = vadd.f32 1.0, %v701_v16 }
  0x96   :  { %702 = vrcp.f32 %v139_v17  ;;  %v151_v23 = vand.u32 2147483648, %v139_v17  ;;  %vm145_vm3 = vweird.f32 %v139_v17  ;;  %v149_v24 = vand.u32 2147483647, %v139_v17 }
  0x98   :  { %v152_v26 = vor.u32 1.1754944e-38, %v151_v23  ;;  %vm150_vm5 = vcmp.eq.f32.partialorder %v149_v24, 8.507059e+37 }
  0x9c   :  { %v703_v18 = vpop.eup %702 }
  0x9d   :  { %v141_v19 = vmul.f32 %v703_v18, %v139_v17  ;;  %vm146_vm2 = vweird.f32 %v703_v18 }
  0x9e   :  { %vm147_vm4 = vmor %vm145_vm3, %vm146_vm2 }
  0x9f   :  { %v142_v20 = vsub.f32 1.0, %v141_v19 }
  0xa1   :  { %v143_v21 = vmul.f32 %v703_v18, %v142_v20 }
  0xa3   :  { %v144_v22 = vadd.f32 %v703_v18, %v143_v21 }
  0xa5   :  { %v148_v25 = vsel %vm147_vm4, %v703_v18, %v144_v22 }
  0xa6   :  { %v153_v28 = vsel %vm150_vm5, %v152_v26, %v148_v25 }
  0xa7   :  { %v156_v30 = vmul.f32 0.0, %v153_v28 }
 0x104   :  { %v159_v27 = vpop.permute.xlu0 %158 }
 0x105   :  { %v161_v29 = vmul.f32 %v159_v27, %v153_v28 }
 0x107   :  { %163 = vrot.lane.b32.xlu0 %v161_v29, %s790_s3 }
 0x179   :  { %v164_v31 = vpop.permute.xlu0 %163 }
 0x17a   :  { %v166_v32 = vadd.f32 %v164_v31, %v156_v30 }
 0x17c   :  { %704 = vtanh.f32 %v166_v32 }
 0x182   :  { %v705_v33 = vpop.eup %704 }
 0x183   :  { %169 = vrot.lane.b32.xlu1 %v705_v33, %s789_s11 }
 0x1f5   :  { %v170_v36 = vpop.permute.xlu1 %169 }
 0x1f6   :  { %v172_v37 = vmul.f32 %v170_v36, %v153_v28 }
 0x1f8   :  { %174 = vrot.lane.b32.xlu1 %v172_v37, %s790_s3 }
 0x26a   :  { %v175_v39 = vpop.permute.xlu1 %174 }
 0x26b   :  { %675 = vmatmul.msk.f32.vlgmr.msrb.gmra.mxu2 %vm111_vm6, %v175_v39 }
 0x26c   :  { %568 = vmatpush.msrb.mxu2 %v836_v2 }
 0x26e   :  { %569 = vmatpush.msrb.mxu2 %v845_v4  ;;  %v26_v4 = vld [vmem:[%s994_s0 + $0x10] sm:$0xff] }
 0x26f   :  { %668 = vmatmul.msk.f32.gmra.mxu0 %vm37_vm1, %v26_v4 }
 0x270   :  { %570 = vmatpush.msrb.mxu2 %v852_v5 }
 0x272   :  { %571 = vmatpush.msrb.mxu2 %v860_v6 }
 0x2ec   :  { %v89_v6 = vpop.f32.mrf.mxu0 }
 0x2ed   :  { %v90_v7 = vadd.f32 %v887_v10, %v89_v6 }
 0x2ee   :  { %v195_v44 = vpop.f32.mrf.mxu2 }
 0x2ef   :  { %v198_v45 = vadd.f32 %v195_v44, %v87_v43 }
 0x2f1   :  { %706 = vtanh.f32 %v198_v45  ;;  %v676_v47 = vmul.f32 -1.442695, %v198_v45 }
 0x2f3   :  { %708 = vpow2.f32 %v676_v47 }
 0x2f7   :  { %v707_v46 = vpop.eup %706 }
 0x2f8   :  { %221 = vrot.lane.b32.xlu2 %v707_v46, %s789_s11 }
 0x2f9   :  { %v709_v48 = vpop.eup %708 }
 0x2fa   :  { %v202_v49 = vadd.f32 1.0, %v709_v48 }
 0x2fc   :  { %710 = vrcp.f32 %v202_v49  ;;  %v214_v55 = vand.u32 2147483648, %v202_v49  ;;  %vm208_vm8 = vweird.f32 %v202_v49  ;;  %v212_v56 = vand.u32 2147483647, %v202_v49 }
 0x2fe   :  { %v215_v58 = vor.u32 1.1754944e-38, %v214_v55  ;;  %vm213_vm10 = vcmp.eq.f32.partialorder %v212_v56, 8.507059e+37 }
 0x302   :  { %v711_v50 = vpop.eup %710 }
 0x303   :  { %v204_v51 = vmul.f32 %v711_v50, %v202_v49  ;;  %vm209_vm7 = vweird.f32 %v711_v50 }
 0x304   :  { %vm210_vm9 = vmor %vm208_vm8, %vm209_vm7 }
 0x305   :  { %v205_v52 = vsub.f32 1.0, %v204_v51 }
 0x307   :  { %v206_v53 = vmul.f32 %v711_v50, %v205_v52 }
 0x309   :  { %v207_v54 = vadd.f32 %v711_v50, %v206_v53 }
 0x30b   :  { %v211_v57 = vsel %vm210_vm9, %v711_v50, %v207_v54 }
 0x30c   :  { %v216_v60 = vsel %vm213_vm10, %v215_v58, %v211_v57 }
 0x30d   :  { %v219_v62 = vmul.f32 %v216_v60, %v166_v32  ;;  %v27_v32 = vld [vmem:[%s994_s0 + $0x18] sm:$0xff] }
 0x30e   :  { %669 = vmatmul.msk.f32.gmra.mxu0 %vm37_vm1, %v27_v32 }
 0x352   :  { %v222_v59 = vpop.permute.xlu2 %221 }
 0x353   :  { %v224_v61 = vmul.f32 %v222_v59, %v216_v60 }
 0x355   :  { %226 = vrot.lane.b32.xlu2 %v224_v61, %s790_s3 }
 0x38b   :  { %v92_v36 = vpop.f32.mrf.mxu0 }
 0x38c   :  { %v93_v37 = vadd.f32 %v887_v10, %v92_v36 }
 0x3af   :  { %v227_v63 = vpop.permute.xlu2 %226 }
 0x3b0   :  { %v229_v0 = vadd.f32 %v227_v63, %v219_v62 }
 0x3b2   :  { %712 = vtanh.f32 %v229_v0 }
 0x3b8   :  { %v713_v1 = vpop.eup %712 }
 0x3b9   :  { %232 = vrot.lane.b32.xlu0 %v713_v1, %s789_s11 }
 0x42b   :  { %v233_v2 = vpop.permute.xlu0 %232 }
 0x42c   :  { %v235_v3 = vmul.f32 %v233_v2, %v216_v60 }
 0x42e   :  { %237 = vrot.lane.b32.xlu1 %v235_v3, %s790_s3 }
 0x4a0   :  { %v238_v5 = vpop.permute.xlu1 %237 }
 0x4a1   :  { %677 = vmatmul.msk.f32.vlgmr.msra.gmra.mxu3 %vm111_vm6, %v238_v5 }
 0x524   :  { %v258_v9 = vpop.f32.mrf.mxu3 }
 0x525   :  { %v261_v11 = vadd.f32 %v258_v9, %v90_v7 }
 0x527   :  { %714 = vtanh.f32 %v261_v11  ;;  %v678_v13 = vmul.f32 -1.442695, %v261_v11 }
 0x529   :  { %716 = vpow2.f32 %v678_v13 }
 0x52d   :  { %v715_v12 = vpop.eup %714 }
 0x52e   :  { %284 = vrot.lane.b32.xlu2 %v715_v12, %s789_s11 }
 0x52f   :  { %v717_v14 = vpop.eup %716 }
 0x530   :  { %v265_v15 = vadd.f32 1.0, %v717_v14 }
 0x532   :  { %718 = vrcp.f32 %v265_v15  ;;  %v277_v21 = vand.u32 2147483648, %v265_v15  ;;  %vm271_vm12 = vweird.f32 %v265_v15  ;;  %v275_v22 = vand.u32 2147483647, %v265_v15 }
 0x534   :  { %v278_v24 = vor.u32 1.1754944e-38, %v277_v21  ;;  %vm276_vm14 = vcmp.eq.f32.partialorder %v275_v22, 8.507059e+37 }
 0x538   :  { %v719_v16 = vpop.eup %718 }
 0x539   :  { %v267_v17 = vmul.f32 %v719_v16, %v265_v15  ;;  %vm272_vm11 = vweird.f32 %v719_v16 }
 0x53a   :  { %vm273_vm13 = vmor %vm271_vm12, %vm272_vm11 }
 0x53b   :  { %v268_v18 = vsub.f32 1.0, %v267_v17 }
 0x53d   :  { %v269_v19 = vmul.f32 %v719_v16, %v268_v18 }
 0x53f   :  { %v270_v20 = vadd.f32 %v719_v16, %v269_v19 }
 0x541   :  { %v274_v23 = vsel %vm273_vm13, %v719_v16, %v270_v20 }
 0x542   :  { %v279_v26 = vsel %vm276_vm14, %v278_v24, %v274_v23 }
 0x543   :  { %v282_v28 = vmul.f32 %v279_v26, %v229_v0  ;;  %v28_v0 = vld [vmem:[%s994_s0 + $0x20] sm:$0xff] }
 0x544   :  { %670 = vmatmul.msk.f32.gmra.mxu0 %vm37_vm1, %v28_v0 }
 0x588   :  { %v285_v25 = vpop.permute.xlu2 %284 }
 0x589   :  { %v287_v27 = vmul.f32 %v285_v25, %v279_v26 }
 0x58b   :  { %289 = vrot.lane.b32.xlu0 %v287_v27, %s790_s3 }
 0x5c1   :  { %v95_v2 = vpop.f32.mrf.mxu0 }
 0x5c2   :  { %v96_v3 = vadd.f32 %v887_v10, %v95_v2 }
 0x5fd   :  { %v290_v29 = vpop.permute.xlu0 %289 }
 0x5fe   :  { %v292_v30 = vadd.f32 %v290_v29, %v282_v28 }
 0x600   :  { %720 = vtanh.f32 %v292_v30 }
 0x606   :  { %v721_v31 = vpop.eup %720 }
 0x607   :  { %295 = vrot.lane.b32.xlu1 %v721_v31, %s789_s11  ;;  %v99_v31 = vadd.f32 %v887_v10, %v882_v8 }
 0x679   :  { %v296_v33 = vpop.permute.xlu1 %295 }
 0x67a   :  { %v298_v34 = vmul.f32 %v296_v33, %v279_v26 }
 0x67c   :  { %300 = vrot.lane.b32.xlu2 %v298_v34, %s790_s3 }
 0x6d6   :  { %v301_v35 = vpop.permute.xlu2 %300 }
 0x6d7   :  { %679 = vmatmul.msk.f32.vlgmr.msra.gmra.mxu1 %vm111_vm6, %v301_v35 }
 0x754   :  { %v321_v38 = vpop.f32.mrf.mxu1 }
 0x755   :  { %v324_v39 = vadd.f32 %v321_v38, %v93_v37 }
 0x757   :  { %722 = vtanh.f32 %v324_v39  ;;  %v680_v43 = vmul.f32 -1.442695, %v324_v39 }
 0x759   :  { %724 = vpow2.f32 %v680_v43 }
 0x75d   :  { %v723_v42 = vpop.eup %722 }
 0x75e   :  { %347 = vrot.lane.b32.xlu0 %v723_v42, %s789_s11 }
 0x75f   :  { %v725_v44 = vpop.eup %724 }
 0x760   :  { %v328_v45 = vadd.f32 1.0, %v725_v44 }
 0x762   :  { %726 = vrcp.f32 %v328_v45  ;;  %v340_v51 = vand.u32 2147483648, %v328_v45  ;;  %vm334_vm0 = vweird.f32 %v328_v45  ;;  %v338_v52 = vand.u32 2147483647, %v328_v45 }
 0x764   :  { %v341_v54 = vor.u32 1.1754944e-38, %v340_v51  ;;  %vm339_vm3 = vcmp.eq.f32.partialorder %v338_v52, 8.507059e+37 }
 0x768   :  { %v727_v46 = vpop.eup %726 }
 0x769   :  { %v330_v47 = vmul.f32 %v727_v46, %v328_v45  ;;  %vm335_vm15 = vweird.f32 %v727_v46 }
 0x76a   :  { %vm336_vm2 = vmor %vm334_vm0, %vm335_vm15 }
 0x76b   :  { %v331_v48 = vsub.f32 1.0, %v330_v47 }
 0x76d   :  { %v332_v49 = vmul.f32 %v727_v46, %v331_v48 }
 0x76f   :  { %v333_v50 = vadd.f32 %v727_v46, %v332_v49 }
 0x771   :  { %v337_v53 = vsel %vm336_vm2, %v727_v46, %v333_v50 }
 0x772   :  { %v342_v56 = vsel %vm339_vm3, %v341_v54, %v337_v53 }
 0x773   :  { %v345_v58 = vmul.f32 %v342_v56, %v292_v30 }
 0x7d0   :  { %v348_v55 = vpop.permute.xlu0 %347 }
 0x7d1   :  { %v350_v57 = vmul.f32 %v348_v55, %v342_v56 }
 0x7d3   :  { %352 = vrot.lane.b32.xlu1 %v350_v57, %s790_s3 }
 0x845   :  { %v353_v59 = vpop.permute.xlu1 %352 }
 0x846   :  { %v355_v60 = vadd.f32 %v353_v59, %v345_v58  ;;  %v102_v58 = vadd.f32 %v887_v10, %v915_v40 }
 0x848   :  { %728 = vtanh.f32 %v355_v60 }
 0x84e   :  { %v729_v61 = vpop.eup %728 }
 0x84f   :  { %358 = vrot.lane.b32.xlu2 %v729_v61, %s789_s11 }
 0x8a9   :  { %v359_v62 = vpop.permute.xlu2 %358 }
 0x8aa   :  { %v361_v63 = vmul.f32 %v359_v62, %v342_v56 }
 0x8ac   :  { %363 = vrot.lane.b32.xlu0 %v361_v63, %s790_s3 }
 0x91e   :  { %v364_v1 = vpop.permute.xlu0 %363 }
 0x91f   :  { %681 = vmatmul.msk.f32.vlgmr.msra.gmra.mxu2 %vm111_vm6, %v364_v1 }
 0x9a2   :  { %v384_v4 = vpop.f32.mrf.mxu2 }
 0x9a3   :  { %v387_v5 = vadd.f32 %v384_v4, %v96_v3 }
 0x9a5   :  { %730 = vtanh.f32 %v387_v5  ;;  %v682_v7 = vmul.f32 -1.442695, %v387_v5 }
 0x9a7   :  { %732 = vpow2.f32 %v682_v7 }
 0x9ab   :  { %v731_v6 = vpop.eup %730 }
 0x9ac   :  { %410 = vrot.lane.b32.xlu1 %v731_v6, %s789_s11 }
 0x9ad   :  { %v733_v9 = vpop.eup %732 }
 0x9ae   :  { %v391_v11 = vadd.f32 1.0, %v733_v9 }
 0x9b0   :  { %734 = vrcp.f32 %v391_v11  ;;  %v403_v17 = vand.u32 2147483648, %v391_v11  ;;  %vm397_vm4 = vweird.f32 %v391_v11  ;;  %v401_v18 = vand.u32 2147483647, %v391_v11 }
 0x9b2   :  { %v404_v20 = vor.u32 1.1754944e-38, %v403_v17  ;;  %vm402_vm7 = vcmp.eq.f32.partialorder %v401_v18, 8.507059e+37 }
 0x9b6   :  { %v735_v12 = vpop.eup %734 }
 0x9b7   :  { %v393_v13 = vmul.f32 %v735_v12, %v391_v11  ;;  %vm398_vm1 = vweird.f32 %v735_v12 }
 0x9b8   :  { %vm399_vm5 = vmor %vm397_vm4, %vm398_vm1  ;;  %vm647_vm4 = vcmask 130048  }
 0x9b9   :  { %v394_v14 = vsub.f32 1.0, %v393_v13 }
 0x9bb   :  { %v395_v15 = vmul.f32 %v735_v12, %v394_v14 }
 0x9bd   :  { %v396_v16 = vadd.f32 %v735_v12, %v395_v15 }
 0x9bf   :  { %v400_v19 = vsel %vm399_vm5, %v735_v12, %v396_v16 }
 0x9c0   :  { %v405_v22 = vsel %vm402_vm7, %v404_v20, %v400_v19 }
 0x9c1   :  { %v408_v24 = vmul.f32 %v405_v22, %v355_v60 }
 0xa1e   :  { %v411_v21 = vpop.permute.xlu1 %410 }
 0xa1f   :  { %v413_v23 = vmul.f32 %v411_v21, %v405_v22  ;;  %v105_v21 = vadd.f32 %v887_v10, %v917_v41 }
 0xa21   :  { %415 = vrot.lane.b32.xlu2 %v413_v23, %s790_s3 }
 0xa7b   :  { %v416_v25 = vpop.permute.xlu2 %415 }
 0xa7c   :  { %v418_v26 = vadd.f32 %v416_v25, %v408_v24 }
 0xa7e   :  { %736 = vtanh.f32 %v418_v26 }
 0xa84   :  { %v737_v27 = vpop.eup %736 }
 0xa85   :  { %421 = vrot.lane.b32.xlu0 %v737_v27, %s789_s11 }
 0xaf7   :  { %v422_v28 = vpop.permute.xlu0 %421 }
 0xaf8   :  { %v424_v29 = vmul.f32 %v422_v28, %v405_v22 }
 0xafa   :  { %426 = vrot.lane.b32.xlu1 %v424_v29, %s790_s3 }
 0xb6c   :  { %v427_v30 = vpop.permute.xlu1 %426 }
 0xb6d   :  { %683 = vmatmul.msk.f32.vlgmr.msrb.gmra.mxu3 %vm111_vm6, %v427_v30 }
 0xbf0   :  { %v447_v32 = vpop.f32.mrf.mxu3 }
 0xbf1   :  { %v450_v33 = vadd.f32 %v447_v32, %v99_v31 }
 0xbf3   :  { %738 = vtanh.f32 %v450_v33  ;;  %v684_v35 = vmul.f32 -1.442695, %v450_v33 }
 0xbf5   :  { %740 = vpow2.f32 %v684_v35 }
 0xbf9   :  { %v739_v34 = vpop.eup %738 }
 0xbfa   :  { %473 = vrot.lane.b32.xlu2 %v739_v34, %s789_s11 }
 0xbfb   :  { %v741_v36 = vpop.eup %740 }
 0xbfc   :  { %v454_v37 = vadd.f32 1.0, %v741_v36 }
 0xbfe   :  { %742 = vrcp.f32 %v454_v37  ;;  %v466_v45 = vand.u32 2147483648, %v454_v37  ;;  %vm460_vm9 = vweird.f32 %v454_v37  ;;  %v464_v8 = vand.u32 2147483647, %v454_v37 }
 0xc00   :  { %v467_v47 = vor.u32 1.1754944e-38, %v466_v45  ;;  %vm465_vm11 = vcmp.eq.f32.partialorder %v464_v8, 8.507059e+37  ;;  %v616_v45 = vld [vmem:[%s998_s4 + $0x10] sm:$0xff]  ;;  %v615_v8 = vld [vmem:[%s998_s4 + $0x8] sm:$0xff] }
 0xc04   :  { %v743_v38 = vpop.eup %742 }
 0xc05   :  { %v456_v39 = vmul.f32 %v743_v38, %v454_v37  ;;  %vm461_vm8 = vweird.f32 %v743_v38 }
 0xc06   :  { %vm462_vm10 = vmor %vm460_vm9, %vm461_vm8 }
 0xc07   :  { %v457_v42 = vsub.f32 1.0, %v456_v39 }
 0xc09   :  { %v458_v43 = vmul.f32 %v743_v38, %v457_v42 }
 0xc0b   :  { %v459_v44 = vadd.f32 %v743_v38, %v458_v43 }
 0xc0d   :  { %v463_v46 = vsel %vm462_vm10, %v743_v38, %v459_v44  ;;  %v617_v44 = vld [vmem:[%s998_s4 + $0x18] sm:$0xff] }
 0xc0e   :  { %v468_v49 = vsel %vm465_vm11, %v467_v47, %v463_v46  ;;  %639 = vmatpush.msra.mxu3 %v617_v44  ;;  %v614_v46 = vld [vmem:[%s998_s4] sm:$0xff] }
 0xc0f   :  { %v471_v51 = vmul.f32 %v468_v49, %v418_v26 }
 0xc10   :  { %640 = vmatpush.msra.mxu3 %v616_v45 }
 0xc12   :  { %641 = vmatpush.msra.mxu3 %v615_v8 }
 0xc14   :  { %642 = vmatpush.msra.mxu3 %v614_v46 }
 0xc54   :  { %v474_v48 = vpop.permute.xlu2 %473 }
 0xc55   :  { %v476_v50 = vmul.f32 %v474_v48, %v468_v49 }
 0xc57   :  { %478 = vrot.lane.b32.xlu0 %v476_v50, %s790_s3  ;;  %v697_v50 = vld [vmem:[%s999_s5] ss:$0 sm:$0xff] }
 0xcc9   :  { %v479_v52 = vpop.permute.xlu0 %478 }
 0xcca   :  { %v481_v53 = vadd.f32 %v479_v52, %v471_v51 }
 0xccc   :  { %744 = vtanh.f32 %v481_v53 }
 0xcd2   :  { %v745_v54 = vpop.eup %744 }
 0xcd3   :  { %484 = vrot.lane.b32.xlu1 %v745_v54, %s789_s11 }
 0xd45   :  { %v485_v55 = vpop.permute.xlu1 %484 }
 0xd46   :  { %v487_v56 = vmul.f32 %v485_v55, %v468_v49 }
 0xd48   :  { %489 = vrot.lane.b32.xlu2 %v487_v56, %s790_s3 }
 0xda2   :  { %v490_v57 = vpop.permute.xlu2 %489 }
 0xda3   :  { %685 = vmatmul.msk.f32.vlgmr.msrb.gmra.mxu1 %vm111_vm6, %v490_v57 }
 0xe20   :  { %v510_v59 = vpop.f32.mrf.mxu1 }
 0xe21   :  { %v513_v60 = vadd.f32 %v510_v59, %v102_v58 }
 0xe23   :  { %746 = vtanh.f32 %v513_v60  ;;  %v686_v62 = vmul.f32 -1.442695, %v513_v60 }
 0xe25   :  { %748 = vpow2.f32 %v686_v62 }
 0xe29   :  { %v747_v61 = vpop.eup %746 }
 0xe2a   :  { %536 = vrot.lane.b32.xlu0 %v747_v61, %s789_s11 }
 0xe2b   :  { %v749_v63 = vpop.eup %748 }
 0xe2c   :  { %v517_v0 = vadd.f32 1.0, %v749_v63 }
 0xe2e   :  { %750 = vrcp.f32 %v517_v0  ;;  %v529_v6 = vand.u32 2147483648, %v517_v0  ;;  %vm523_vm13 = vweird.f32 %v517_v0  ;;  %v527_v40 = vand.u32 2147483647, %v517_v0 }
 0xe30   :  { %v530_v9 = vor.u32 1.1754944e-38, %v529_v6  ;;  %vm528_vm15 = vcmp.eq.f32.partialorder %v527_v40, 8.507059e+37 }
 0xe34   :  { %v751_v1 = vpop.eup %750 }
 0xe35   :  { %v519_v2 = vmul.f32 %v751_v1, %v517_v0  ;;  %vm524_vm12 = vweird.f32 %v751_v1 }
 0xe36   :  { %vm525_vm14 = vmor %vm523_vm13, %vm524_vm12 }
 0xe37   :  { %v520_v3 = vsub.f32 1.0, %v519_v2 }
 0xe39   :  { %v521_v4 = vmul.f32 %v751_v1, %v520_v3 }
 0xe3b   :  { %v522_v5 = vadd.f32 %v751_v1, %v521_v4 }
 0xe3d   :  { %v526_v7 = vsel %vm525_vm14, %v751_v1, %v522_v5 }
 0xe3e   :  { %v531_v12 = vsel %vm528_vm15, %v530_v9, %v526_v7 }
 0xe3f   :  { %v534_v14 = vmul.f32 %v531_v12, %v481_v53 }
 0xe9c   :  { %v537_v11 = vpop.permute.xlu0 %536 }
 0xe9d   :  { %v539_v13 = vmul.f32 %v537_v11, %v531_v12 }
 0xe9f   :  { %541 = vrot.lane.b32.xlu1 %v539_v13, %s790_s3 }
 0xf11   :  { %v542_v15 = vpop.permute.xlu1 %541 }
 0xf12   :  { %v544_v16 = vadd.f32 %v542_v15, %v534_v14 }
 0xf14   :  { %752 = vtanh.f32 %v544_v16 }
 0xf1a   :  { %v753_v17 = vpop.eup %752 }
 0xf1b   :  { %547 = vrot.lane.b32.xlu2 %v753_v17, %s789_s11 }
 0xf75   :  { %v548_v18 = vpop.permute.xlu2 %547 }
 0xf76   :  { %v550_v19 = vmul.f32 %v548_v18, %v531_v12 }
 0xf78   :  { %552 = vrot.lane.b32.xlu0 %v550_v19, %s790_s3 }
 0xfea   :  { %v553_v20 = vpop.permute.xlu0 %552 }
 0xfeb   :  { %687 = vmatmul.msk.f32.vlgmr.msrb.gmra.mxu2 %vm111_vm6, %v553_v20 }
0x106e   :  { %v573_v22 = vpop.f32.mrf.mxu2 }
0x106f   :  { %v576_v23 = vadd.f32 %v573_v22, %v105_v21 }
0x1071   :  { %754 = vtanh.f32 %v576_v23  ;;  %v688_v25 = vmul.f32 -1.442695, %v576_v23 }
0x1073   :  { %756 = vpow2.f32 %v688_v25 }
0x1077   :  { %v755_v24 = vpop.eup %754 }
0x1078   :  { %599 = vrot.lane.b32.xlu1 %v755_v24, %s789_s11 }
0x1079   :  { %v757_v26 = vpop.eup %756 }
0x107a   :  { %v580_v27 = vadd.f32 1.0, %v757_v26 }
0x107c   :  { %758 = vrcp.f32 %v580_v27  ;;  %v592_v33 = vand.u32 2147483648, %v580_v27  ;;  %vm586_vm2 = vweird.f32 %v580_v27  ;;  %v590_v10 = vand.u32 2147483647, %v580_v27 }
0x107e   :  { %v593_v34 = vor.u32 1.1754944e-38, %v592_v33  ;;  %vm591_vm1 = vcmp.eq.f32.partialorder %v590_v10, 8.507059e+37 }
0x1082   :  { %v759_v28 = vpop.eup %758 }
0x1083   :  { %v582_v29 = vmul.f32 %v759_v28, %v580_v27  ;;  %vm587_vm0 = vweird.f32 %v759_v28 }
0x1084   :  { %vm588_vm3 = vmor %vm586_vm2, %vm587_vm0 }
0x1085   :  { %v583_v30 = vsub.f32 1.0, %v582_v29 }
0x1087   :  { %v584_v31 = vmul.f32 %v759_v28, %v583_v30 }
0x1089   :  { %v585_v32 = vadd.f32 %v759_v28, %v584_v31 }
0x108b   :  { %v589_v41 = vsel %vm588_vm3, %v759_v28, %v585_v32 }
0x108c   :  { %v594_v36 = vsel %vm591_vm1, %v593_v34, %v589_v41 }
0x108d   :  { %v597_v38 = vmul.f32 %v594_v36, %v544_v16 }
0x10ea   :  { %v600_v35 = vpop.permute.xlu1 %599 }
0x10eb   :  { %v602_v37 = vmul.f32 %v600_v35, %v594_v36 }
0x10ed   :  { %604 = vrot.lane.b32.xlu2 %v602_v37, %s790_s3 }
0x1147   :  { %v605_v39 = vpop.permute.xlu2 %604 }
0x1148   :  { %v607_v42 = vadd.f32 %v605_v39, %v597_v38 }
0x114a   :  { %760 = vtanh.f32 %v607_v42 }
0x1150   :  { %v761_v43 = vpop.eup %760 }
0x1151   :  { %610 = vrot.lane.b32.xlu0 %v761_v43, %s789_s11  ;;  %s656_s11 = sshll.u32 %s1000_s6, 4  ;;  %s657_s11 = int_to_ptr.hbm [resolvable:$true] %s656_s11 }
0x11c3   :  { %v611_v47 = vpop.permute.xlu0 %610 }
0x11c4   :  { %v613_v48 = vmul.f32 %v611_v47, %v594_v36 }
0x11c6   :  { %623 = vrot.lane.b32.xlu1 %v613_v48, %s790_s3 }
0x1238   :  { %v624_v49 = vpop.permute.xlu1 %623 }
0x1239   :  { %689 = vmatmul.msk.f32.vlgmr.msra.gmra.mxu3 %vm111_vm6, %v624_v49 }
0x12bc   :  { %v644_v51 = vpop.f32.mrf.mxu3 }
0x12bd   :  { %v645_v52 = vadd.f32 %v697_v50, %v644_v51 }
0x12bf   :  { %648 = vst.msk [vmem:[#allocation2] sm:$0xff] %vm647_vm4, %v645_v52 }
0x12c0   :  { %659 = dma.vmem_to_hbm [thread:$0]  %s655_s9, 128, %s657_s11, [#allocation3]  }
0x12c1   :  { %786 = dma.done.wait [#allocation3], 128  }
0x12c2   :  { %787 = vsyncadd [#allocation3], 4294967168 }
0x12c3   :  { %664 = vsyncpa [#allocation3], 1 }

</bundles_post_ra>
